<compile_context>
chip_gen: v7x
topology: tpu7x:2x2x1
jax: 0.10.0
libtpu: 0.0.40
codegen_flags: <defaults>
</compile_context>

<pallas_src>
import functools
import math

import jax
import jax.numpy as jnp
import numpy as np
from jax.experimental import pallas as pl
from jax.experimental.pallas import tpu as pltpu


def _plstm_kernel(x_ref, wx_ref, b_ref, wh_ref, zc_ref, out_ref, *,
                  seq_len, mem_dim, batch_block):
    T, Bc, M = seq_len, batch_block, mem_dim

    # Hoisted input projection: one (T*Bc, in_dim) @ (in_dim, 4*mem) MXU matmul with the
    # pre-fused bias folded in.  Kept as a value (vreg-resident), not a VMEM scratch.
    x = x_ref[...]                                        # (T, Bc, in_dim)
    in_dim = x.shape[-1]
    xproj = (jnp.dot(x.reshape(T * Bc, in_dim), wx_ref[...],
                     preferred_element_type=jnp.float32)
             + b_ref[...])                                # (T*Bc, 4*mem)
    xproj = xproj.reshape(T, Bc, 4 * M)                   # time-major slabs

    wh = wh_ref[...]                                      # (mem, 4*mem), loaded once
    zc_b = jnp.broadcast_to(zc_ref[...], (Bc, M))         # hoisted broadcast (no per-step
                                                          # broadcast_in_dim in the loop)

    c = jnp.zeros((Bc, M), jnp.float32)
    h = jnp.zeros((Bc, M), jnp.float32)

    # Static full unroll over time (T is small here); static t keeps xproj[t] a free
    # vreg-slab select.  See TODO(synk) above for the long-T chunked/capped-unroll path.
    for t in range(T):
        # Recurrence-only matmul + precomputed x-projection slab for this timestep.
        iofu = xproj[t] + jnp.dot(h, wh, preferred_element_type=jnp.float32)
        # Single sigmoid pass over the contiguous [i | o | f] lanes, then split.
        iof = jax.nn.sigmoid(iofu[:, :3 * M])
        i_g = iof[:, 0 * M:1 * M]
        o_g = iof[:, 1 * M:2 * M]
        f_g = iof[:, 2 * M:3 * M]
        u_g = jnp.tanh(iofu[:, 3 * M:] + zc_b * c)
        c = i_g * u_g + f_g * c
        h = o_g * jnp.tanh(c)                             # use_o=True branch

    # Single merged [c | h] store (one output writeback per batch chunk).
    out_ref[...] = jnp.concatenate([c, h], axis=1).astype(out_ref.dtype)


def plstm_forward(inputs, wx, bx, wh, bh, zc, *, batch_chunks=2):
    """inputs: (T, B, in_dim) f32 — B independent sequences (module is the B=1 case).

    Returns (c_t, h_t), each (B, mem_dim)."""
    T, B, in_dim = inputs.shape
    mem = zc.shape[-1]
    if B % batch_chunks != 0:
        batch_chunks = 1
    Bc = B // batch_chunks

    b = (bx + bh).reshape(1, 4 * mem)                     # pre-fused biases

    kernel = functools.partial(_plstm_kernel, seq_len=T, mem_dim=mem, batch_block=Bc)

    grid_spec = pltpu.PrefetchScalarGridSpec(
        num_scalar_prefetch=0,
        grid=(batch_chunks,),                             # batch chunks -> v7x cores
        in_specs=[
            pl.BlockSpec((T, Bc, in_dim), lambda i: (0, i, 0)),      # X (batch-chunked)
            pl.BlockSpec((in_dim, 4 * mem), lambda i: (0, 0)),       # Wx
            pl.BlockSpec((1, 4 * mem), lambda i: (0, 0)),            # b = bx + bh
            pl.BlockSpec((mem, 4 * mem), lambda i: (0, 0)),          # Wh
            pl.BlockSpec((1, mem), lambda i: (0, 0)),                # zc
        ],
        out_specs=pl.BlockSpec((Bc, 2 * mem), lambda i: (i, 0)),     # [c | h]
    )

    out = pl.pallas_call(
        kernel,
        out_shape=jax.ShapeDtypeStruct((B, 2 * mem), jnp.float32),
        grid_spec=grid_spec,
        compiler_params=pltpu.CompilerParams(
            dimension_semantics=("parallel",)),
    )(inputs, wx, b, wh, zc)

    return out[:, :mem], out[:, mem:]


def plstm_reference(inputs, wx, bx, wh, bh, zc):
    """Pure-JAX reference mirroring the PyTorch node_forward loop (vectorized over B)."""
    T, B, _ = inputs.shape
    M = zc.shape[-1]
    c = jnp.zeros((B, M), jnp.float32)
    h = jnp.zeros((B, M), jnp.float32)
    for t in range(T):
        iofu = inputs[t] @ wx + bx + h @ wh + bh
        i_g, o_g, f_g, u_g = jnp.split(iofu, 4, axis=1)
        i_g = jax.nn.sigmoid(i_g)
        o_g = jax.nn.sigmoid(o_g)
        f_g = jax.nn.sigmoid(f_g)
        u_g = jnp.tanh(u_g + zc * c)
        c = i_g * u_g + f_g * c
        h = o_g * jnp.tanh(c)
    return c, h


if __name__ == "__main__":
    in_dim, mem_dim, T, B = 32, 32, 8, 16

    key = jax.random.PRNGKey(0)
    k_x, k_wx, k_bx, k_wh, k_bh, k_zc = jax.random.split(key, 6)

    # Deterministic parameter init mimicking nn.Linear / the module's uniform init.
    stdv_x = 1.0 / math.sqrt(in_dim)
    stdv_h = 1.0 / math.sqrt(mem_dim)
    wx = jax.random.uniform(k_wx, (in_dim, 4 * mem_dim), jnp.float32, -stdv_x, stdv_x)
    bx = jax.random.uniform(k_bx, (1, 4 * mem_dim), jnp.float32, -stdv_x, stdv_x)
    wh = jax.random.uniform(k_wh, (mem_dim, 4 * mem_dim), jnp.float32, -stdv_h, stdv_h)
    bh = jax.random.uniform(k_bh, (1, 4 * mem_dim), jnp.float32, -stdv_h, stdv_h)
    zc = jax.random.uniform(k_zc, (1, mem_dim), jnp.float32, -stdv_h, stdv_h)

    inputs = jax.random.normal(k_x, (T, B, in_dim), jnp.float32)

    c_t, h_t = plstm_forward(inputs, wx, bx, wh, bh, zc, batch_chunks=2)
    jax.block_until_ready((c_t, h_t))

    c_ref, h_ref = plstm_reference(inputs, wx, bx, wh, bh, zc)
    np.testing.assert_allclose(np.asarray(c_t), np.asarray(c_ref), rtol=1e-5, atol=1e-5)
    np.testing.assert_allclose(np.asarray(h_t), np.asarray(h_ref), rtol=1e-5, atol=1e-5)

    print("KERNEL_OK")
</pallas_src>

<mosaic_0001>
module attributes {stable_mosaic.version = 11 : i64} {
  func.func @_plstm_kernel(%arg0: i32, %arg1: memref<8x8x32xf32, #tpu.memory_space<vmem>>, %arg2: memref<32x128xf32, #tpu.memory_space<vmem>>, %arg3: memref<1x128xf32, #tpu.memory_space<vmem>>, %arg4: memref<32x128xf32, #tpu.memory_space<vmem>>, %arg5: memref<1x32xf32, #tpu.memory_space<vmem>>, %arg6: memref<8x64xf32, #tpu.memory_space<vmem>>) attributes {dimension_semantics = [#tpu.dimension_semantics<parallel>], iteration_bounds = array<i64: 2>, scalar_prefetch = 0 : i64, scratch_operands = 0 : i64, tpu.core_type = #tpu.core_type<tc>, window_params = [{transform_indices = @transform_0, window_bounds = array<i64: 8, 8, 32>}, {pipeline_mode = #tpu.pipeline_mode<synchronous>, transform_indices = @transform_1, window_bounds = array<i64: 32, 128>}, {pipeline_mode = #tpu.pipeline_mode<synchronous>, transform_indices = @transform_2, window_bounds = array<i64: 1, 128>}, {pipeline_mode = #tpu.pipeline_mode<synchronous>, transform_indices = @transform_3, window_bounds = array<i64: 32, 128>}, {pipeline_mode = #tpu.pipeline_mode<synchronous>, transform_indices = @transform_4, window_bounds = array<i64: 1, 32>}, {transform_indices = @transform_5, window_bounds = array<i64: 8, 64>}]} {
    %c0 = arith.constant 0 : index
    %c0_0 = arith.constant 0 : index
    %c0_1 = arith.constant 0 : index
    %0 = vector.load %arg1[%c0, %c0_0, %c0_1] : memref<8x8x32xf32, #tpu.memory_space<vmem>>, vector<8x8x32xf32>
    %1 = vector.shape_cast %0 : vector<8x8x32xf32> to vector<64x32xf32>
    %c0_2 = arith.constant 0 : index
    %c0_3 = arith.constant 0 : index
    %2 = vector.load %arg2[%c0_2, %c0_3] : memref<32x128xf32, #tpu.memory_space<vmem>>, vector<32x128xf32>
    %cst = arith.constant dense<0.000000e+00> : vector<64x128xf32>
    %3 = tpu.matmul %1, %2, %cst {dimension_numbers = #tpu.dot_dimension_numbers<[1], [0], [0], [1], [0, 0, 1, 1], [], []>} : vector<64x32xf32>, vector<32x128xf32>, vector<64x128xf32> -> vector<64x128xf32>
    %c0_4 = arith.constant 0 : index
    %c0_5 = arith.constant 0 : index
    %4 = vector.load %arg3[%c0_4, %c0_5] : memref<1x128xf32, #tpu.memory_space<vmem>>, vector<1x128xf32>
    %5 = vector.broadcast %4 : vector<1x128xf32> to vector<64x128xf32>
    %6 = arith.addf %3, %5 : vector<64x128xf32>
    %7 = vector.shape_cast %6 : vector<64x128xf32> to vector<8x8x128xf32>
    %c0_6 = arith.constant 0 : index
    %c0_7 = arith.constant 0 : index
    %8 = vector.load %arg4[%c0_6, %c0_7] : memref<32x128xf32, #tpu.memory_space<vmem>>, vector<32x128xf32>
    %c0_8 = arith.constant 0 : index
    %c0_9 = arith.constant 0 : index
    %9 = vector.load %arg5[%c0_8, %c0_9] : memref<1x32xf32, #tpu.memory_space<vmem>>, vector<1x32xf32>
    %10 = vector.shape_cast %9 : vector<1x32xf32> to vector<1x32xf32>
    %11 = vector.broadcast %10 : vector<1x32xf32> to vector<8x32xf32>
    %cst_10 = arith.constant 0.000000e+00 : f32
    %12 = vector.broadcast %cst_10 : f32 to vector<8x32xf32>
    %cst_11 = arith.constant 0.000000e+00 : f32
    %13 = vector.broadcast %cst_11 : f32 to vector<8x32xf32>
    %14 = vector.extract_strided_slice %7 {offsets = [0, 0, 0], sizes = [1, 8, 128], strides = [1, 1, 1]} : vector<8x8x128xf32> to vector<1x8x128xf32>
    %15 = vector.shape_cast %14 : vector<1x8x128xf32> to vector<8x128xf32>
    %cst_12 = arith.constant dense<0.000000e+00> : vector<8x128xf32>
    %16 = tpu.matmul %13, %8, %cst_12 {dimension_numbers = #tpu.dot_dimension_numbers<[1], [0], [0], [1], [0, 0, 1, 1], [], []>} : vector<8x32xf32>, vector<32x128xf32>, vector<8x128xf32> -> vector<8x128xf32>
    %17 = arith.addf %15, %16 : vector<8x128xf32>
    %18 = vector.extract_strided_slice %17 {offsets = [0, 0], sizes = [8, 96], strides = [1, 1]} : vector<8x128xf32> to vector<8x96xf32>
    %19 = arith.negf %18 : vector<8x96xf32>
    %20 = math.exp %19 : vector<8x96xf32>
    %cst_13 = arith.constant 1.000000e+00 : f32
    %21 = vector.broadcast %cst_13 : f32 to vector<8x96xf32>
    %22 = arith.addf %21, %20 : vector<8x96xf32>
    %23 = arith.divf %21, %22 : vector<8x96xf32>
    %24 = vector.extract_strided_slice %23 {offsets = [0, 0], sizes = [8, 32], strides = [1, 1]} : vector<8x96xf32> to vector<8x32xf32>
    %25 = vector.extract_strided_slice %23 {offsets = [0, 32], sizes = [8, 32], strides = [1, 1]} : vector<8x96xf32> to vector<8x32xf32>
    %26 = vector.extract_strided_slice %23 {offsets = [0, 64], sizes = [8, 32], strides = [1, 1]} : vector<8x96xf32> to vector<8x32xf32>
    %27 = vector.extract_strided_slice %17 {offsets = [0, 96], sizes = [8, 32], strides = [1, 1]} : vector<8x128xf32> to vector<8x32xf32>
    %28 = arith.mulf %11, %12 : vector<8x32xf32>
    %29 = arith.addf %27, %28 : vector<8x32xf32>
    %30 = math.tanh %29 : vector<8x32xf32>
    %31 = arith.mulf %24, %30 : vector<8x32xf32>
    %32 = arith.mulf %26, %12 : vector<8x32xf32>
    %33 = arith.addf %31, %32 : vector<8x32xf32>
    %34 = math.tanh %33 : vector<8x32xf32>
    %35 = arith.mulf %25, %34 : vector<8x32xf32>
    %36 = vector.extract_strided_slice %7 {offsets = [1, 0, 0], sizes = [1, 8, 128], strides = [1, 1, 1]} : vector<8x8x128xf32> to vector<1x8x128xf32>
    %37 = vector.shape_cast %36 : vector<1x8x128xf32> to vector<8x128xf32>
    %cst_14 = arith.constant dense<0.000000e+00> : vector<8x128xf32>
    %38 = tpu.matmul %35, %8, %cst_14 {dimension_numbers = #tpu.dot_dimension_numbers<[1], [0], [0], [1], [0, 0, 1, 1], [], []>} : vector<8x32xf32>, vector<32x128xf32>, vector<8x128xf32> -> vector<8x128xf32>
    %39 = arith.addf %37, %38 : vector<8x128xf32>
    %40 = vector.extract_strided_slice %39 {offsets = [0, 0], sizes = [8, 96], strides = [1, 1]} : vector<8x128xf32> to vector<8x96xf32>
    %41 = arith.negf %40 : vector<8x96xf32>
    %42 = math.exp %41 : vector<8x96xf32>
    %cst_15 = arith.constant 1.000000e+00 : f32
    %43 = vector.broadcast %cst_15 : f32 to vector<8x96xf32>
    %44 = arith.addf %43, %42 : vector<8x96xf32>
    %45 = arith.divf %43, %44 : vector<8x96xf32>
    %46 = vector.extract_strided_slice %45 {offsets = [0, 0], sizes = [8, 32], strides = [1, 1]} : vector<8x96xf32> to vector<8x32xf32>
    %47 = vector.extract_strided_slice %45 {offsets = [0, 32], sizes = [8, 32], strides = [1, 1]} : vector<8x96xf32> to vector<8x32xf32>
    %48 = vector.extract_strided_slice %45 {offsets = [0, 64], sizes = [8, 32], strides = [1, 1]} : vector<8x96xf32> to vector<8x32xf32>
    %49 = vector.extract_strided_slice %39 {offsets = [0, 96], sizes = [8, 32], strides = [1, 1]} : vector<8x128xf32> to vector<8x32xf32>
    %50 = arith.mulf %11, %33 : vector<8x32xf32>
    %51 = arith.addf %49, %50 : vector<8x32xf32>
    %52 = math.tanh %51 : vector<8x32xf32>
    %53 = arith.mulf %46, %52 : vector<8x32xf32>
    %54 = arith.mulf %48, %33 : vector<8x32xf32>
    %55 = arith.addf %53, %54 : vector<8x32xf32>
    %56 = math.tanh %55 : vector<8x32xf32>
    %57 = arith.mulf %47, %56 : vector<8x32xf32>
    %58 = vector.extract_strided_slice %7 {offsets = [2, 0, 0], sizes = [1, 8, 128], strides = [1, 1, 1]} : vector<8x8x128xf32> to vector<1x8x128xf32>
    %59 = vector.shape_cast %58 : vector<1x8x128xf32> to vector<8x128xf32>
    %cst_16 = arith.constant dense<0.000000e+00> : vector<8x128xf32>
    %60 = tpu.matmul %57, %8, %cst_16 {dimension_numbers = #tpu.dot_dimension_numbers<[1], [0], [0], [1], [0, 0, 1, 1], [], []>} : vector<8x32xf32>, vector<32x128xf32>, vector<8x128xf32> -> vector<8x128xf32>
    %61 = arith.addf %59, %60 : vector<8x128xf32>
    %62 = vector.extract_strided_slice %61 {offsets = [0, 0], sizes = [8, 96], strides = [1, 1]} : vector<8x128xf32> to vector<8x96xf32>
    %63 = arith.negf %62 : vector<8x96xf32>
    %64 = math.exp %63 : vector<8x96xf32>
    %cst_17 = arith.constant 1.000000e+00 : f32
    %65 = vector.broadcast %cst_17 : f32 to vector<8x96xf32>
    %66 = arith.addf %65, %64 : vector<8x96xf32>
    %67 = arith.divf %65, %66 : vector<8x96xf32>
    %68 = vector.extract_strided_slice %67 {offsets = [0, 0], sizes = [8, 32], strides = [1, 1]} : vector<8x96xf32> to vector<8x32xf32>
    %69 = vector.extract_strided_slice %67 {offsets = [0, 32], sizes = [8, 32], strides = [1, 1]} : vector<8x96xf32> to vector<8x32xf32>
    %70 = vector.extract_strided_slice %67 {offsets = [0, 64], sizes = [8, 32], strides = [1, 1]} : vector<8x96xf32> to vector<8x32xf32>
    %71 = vector.extract_strided_slice %61 {offsets = [0, 96], sizes = [8, 32], strides = [1, 1]} : vector<8x128xf32> to vector<8x32xf32>
    %72 = arith.mulf %11, %55 : vector<8x32xf32>
    %73 = arith.addf %71, %72 : vector<8x32xf32>
    %74 = math.tanh %73 : vector<8x32xf32>
    %75 = arith.mulf %68, %74 : vector<8x32xf32>
    %76 = arith.mulf %70, %55 : vector<8x32xf32>
    %77 = arith.addf %75, %76 : vector<8x32xf32>
    %78 = math.tanh %77 : vector<8x32xf32>
    %79 = arith.mulf %69, %78 : vector<8x32xf32>
    %80 = vector.extract_strided_slice %7 {offsets = [3, 0, 0], sizes = [1, 8, 128], strides = [1, 1, 1]} : vector<8x8x128xf32> to vector<1x8x128xf32>
    %81 = vector.shape_cast %80 : vector<1x8x128xf32> to vector<8x128xf32>
    %cst_18 = arith.constant dense<0.000000e+00> : vector<8x128xf32>
    %82 = tpu.matmul %79, %8, %cst_18 {dimension_numbers = #tpu.dot_dimension_numbers<[1], [0], [0], [1], [0, 0, 1, 1], [], []>} : vector<8x32xf32>, vector<32x128xf32>, vector<8x128xf32> -> vector<8x128xf32>
    %83 = arith.addf %81, %82 : vector<8x128xf32>
    %84 = vector.extract_strided_slice %83 {offsets = [0, 0], sizes = [8, 96], strides = [1, 1]} : vector<8x128xf32> to vector<8x96xf32>
    %85 = arith.negf %84 : vector<8x96xf32>
    %86 = math.exp %85 : vector<8x96xf32>
    %cst_19 = arith.constant 1.000000e+00 : f32
    %87 = vector.broadcast %cst_19 : f32 to vector<8x96xf32>
    %88 = arith.addf %87, %86 : vector<8x96xf32>
    %89 = arith.divf %87, %88 : vector<8x96xf32>
    %90 = vector.extract_strided_slice %89 {offsets = [0, 0], sizes = [8, 32], strides = [1, 1]} : vector<8x96xf32> to vector<8x32xf32>
    %91 = vector.extract_strided_slice %89 {offsets = [0, 32], sizes = [8, 32], strides = [1, 1]} : vector<8x96xf32> to vector<8x32xf32>
    %92 = vector.extract_strided_slice %89 {offsets = [0, 64], sizes = [8, 32], strides = [1, 1]} : vector<8x96xf32> to vector<8x32xf32>
    %93 = vector.extract_strided_slice %83 {offsets = [0, 96], sizes = [8, 32], strides = [1, 1]} : vector<8x128xf32> to vector<8x32xf32>
    %94 = arith.mulf %11, %77 : vector<8x32xf32>
    %95 = arith.addf %93, %94 : vector<8x32xf32>
    %96 = math.tanh %95 : vector<8x32xf32>
    %97 = arith.mulf %90, %96 : vector<8x32xf32>
    %98 = arith.mulf %92, %77 : vector<8x32xf32>
    %99 = arith.addf %97, %98 : vector<8x32xf32>
    %100 = math.tanh %99 : vector<8x32xf32>
    %101 = arith.mulf %91, %100 : vector<8x32xf32>
    %102 = vector.extract_strided_slice %7 {offsets = [4, 0, 0], sizes = [1, 8, 128], strides = [1, 1, 1]} : vector<8x8x128xf32> to vector<1x8x128xf32>
    %103 = vector.shape_cast %102 : vector<1x8x128xf32> to vector<8x128xf32>
    %cst_20 = arith.constant dense<0.000000e+00> : vector<8x128xf32>
    %104 = tpu.matmul %101, %8, %cst_20 {dimension_numbers = #tpu.dot_dimension_numbers<[1], [0], [0], [1], [0, 0, 1, 1], [], []>} : vector<8x32xf32>, vector<32x128xf32>, vector<8x128xf32> -> vector<8x128xf32>
    %105 = arith.addf %103, %104 : vector<8x128xf32>
    %106 = vector.extract_strided_slice %105 {offsets = [0, 0], sizes = [8, 96], strides = [1, 1]} : vector<8x128xf32> to vector<8x96xf32>
    %107 = arith.negf %106 : vector<8x96xf32>
    %108 = math.exp %107 : vector<8x96xf32>
    %cst_21 = arith.constant 1.000000e+00 : f32
    %109 = vector.broadcast %cst_21 : f32 to vector<8x96xf32>
    %110 = arith.addf %109, %108 : vector<8x96xf32>
    %111 = arith.divf %109, %110 : vector<8x96xf32>
    %112 = vector.extract_strided_slice %111 {offsets = [0, 0], sizes = [8, 32], strides = [1, 1]} : vector<8x96xf32> to vector<8x32xf32>
    %113 = vector.extract_strided_slice %111 {offsets = [0, 32], sizes = [8, 32], strides = [1, 1]} : vector<8x96xf32> to vector<8x32xf32>
    %114 = vector.extract_strided_slice %111 {offsets = [0, 64], sizes = [8, 32], strides = [1, 1]} : vector<8x96xf32> to vector<8x32xf32>
    %115 = vector.extract_strided_slice %105 {offsets = [0, 96], sizes = [8, 32], strides = [1, 1]} : vector<8x128xf32> to vector<8x32xf32>
    %116 = arith.mulf %11, %99 : vector<8x32xf32>
    %117 = arith.addf %115, %116 : vector<8x32xf32>
    %118 = math.tanh %117 : vector<8x32xf32>
    %119 = arith.mulf %112, %118 : vector<8x32xf32>
    %120 = arith.mulf %114, %99 : vector<8x32xf32>
    %121 = arith.addf %119, %120 : vector<8x32xf32>
    %122 = math.tanh %121 : vector<8x32xf32>
    %123 = arith.mulf %113, %122 : vector<8x32xf32>
    %124 = vector.extract_strided_slice %7 {offsets = [5, 0, 0], sizes = [1, 8, 128], strides = [1, 1, 1]} : vector<8x8x128xf32> to vector<1x8x128xf32>
    %125 = vector.shape_cast %124 : vector<1x8x128xf32> to vector<8x128xf32>
    %cst_22 = arith.constant dense<0.000000e+00> : vector<8x128xf32>
    %126 = tpu.matmul %123, %8, %cst_22 {dimension_numbers = #tpu.dot_dimension_numbers<[1], [0], [0], [1], [0, 0, 1, 1], [], []>} : vector<8x32xf32>, vector<32x128xf32>, vector<8x128xf32> -> vector<8x128xf32>
    %127 = arith.addf %125, %126 : vector<8x128xf32>
    %128 = vector.extract_strided_slice %127 {offsets = [0, 0], sizes = [8, 96], strides = [1, 1]} : vector<8x128xf32> to vector<8x96xf32>
    %129 = arith.negf %128 : vector<8x96xf32>
    %130 = math.exp %129 : vector<8x96xf32>
    %cst_23 = arith.constant 1.000000e+00 : f32
    %131 = vector.broadcast %cst_23 : f32 to vector<8x96xf32>
    %132 = arith.addf %131, %130 : vector<8x96xf32>
    %133 = arith.divf %131, %132 : vector<8x96xf32>
    %134 = vector.extract_strided_slice %133 {offsets = [0, 0], sizes = [8, 32], strides = [1, 1]} : vector<8x96xf32> to vector<8x32xf32>
    %135 = vector.extract_strided_slice %133 {offsets = [0, 32], sizes = [8, 32], strides = [1, 1]} : vector<8x96xf32> to vector<8x32xf32>
    %136 = vector.extract_strided_slice %133 {offsets = [0, 64], sizes = [8, 32], strides = [1, 1]} : vector<8x96xf32> to vector<8x32xf32>
    %137 = vector.extract_strided_slice %127 {offsets = [0, 96], sizes = [8, 32], strides = [1, 1]} : vector<8x128xf32> to vector<8x32xf32>
    %138 = arith.mulf %11, %121 : vector<8x32xf32>
    %139 = arith.addf %137, %138 : vector<8x32xf32>
    %140 = math.tanh %139 : vector<8x32xf32>
    %141 = arith.mulf %134, %140 : vector<8x32xf32>
    %142 = arith.mulf %136, %121 : vector<8x32xf32>
    %143 = arith.addf %141, %142 : vector<8x32xf32>
    %144 = math.tanh %143 : vector<8x32xf32>
    %145 = arith.mulf %135, %144 : vector<8x32xf32>
    %146 = vector.extract_strided_slice %7 {offsets = [6, 0, 0], sizes = [1, 8, 128], strides = [1, 1, 1]} : vector<8x8x128xf32> to vector<1x8x128xf32>
    %147 = vector.shape_cast %146 : vector<1x8x128xf32> to vector<8x128xf32>
    %cst_24 = arith.constant dense<0.000000e+00> : vector<8x128xf32>
    %148 = tpu.matmul %145, %8, %cst_24 {dimension_numbers = #tpu.dot_dimension_numbers<[1], [0], [0], [1], [0, 0, 1, 1], [], []>} : vector<8x32xf32>, vector<32x128xf32>, vector<8x128xf32> -> vector<8x128xf32>
    %149 = arith.addf %147, %148 : vector<8x128xf32>
    %150 = vector.extract_strided_slice %149 {offsets = [0, 0], sizes = [8, 96], strides = [1, 1]} : vector<8x128xf32> to vector<8x96xf32>
    %151 = arith.negf %150 : vector<8x96xf32>
    %152 = math.exp %151 : vector<8x96xf32>
    %cst_25 = arith.constant 1.000000e+00 : f32
    %153 = vector.broadcast %cst_25 : f32 to vector<8x96xf32>
    %154 = arith.addf %153, %152 : vector<8x96xf32>
    %155 = arith.divf %153, %154 : vector<8x96xf32>
    %156 = vector.extract_strided_slice %155 {offsets = [0, 0], sizes = [8, 32], strides = [1, 1]} : vector<8x96xf32> to vector<8x32xf32>
    %157 = vector.extract_strided_slice %155 {offsets = [0, 32], sizes = [8, 32], strides = [1, 1]} : vector<8x96xf32> to vector<8x32xf32>
    %158 = vector.extract_strided_slice %155 {offsets = [0, 64], sizes = [8, 32], strides = [1, 1]} : vector<8x96xf32> to vector<8x32xf32>
    %159 = vector.extract_strided_slice %149 {offsets = [0, 96], sizes = [8, 32], strides = [1, 1]} : vector<8x128xf32> to vector<8x32xf32>
    %160 = arith.mulf %11, %143 : vector<8x32xf32>
    %161 = arith.addf %159, %160 : vector<8x32xf32>
    %162 = math.tanh %161 : vector<8x32xf32>
    %163 = arith.mulf %156, %162 : vector<8x32xf32>
    %164 = arith.mulf %158, %143 : vector<8x32xf32>
    %165 = arith.addf %163, %164 : vector<8x32xf32>
    %166 = math.tanh %165 : vector<8x32xf32>
    %167 = arith.mulf %157, %166 : vector<8x32xf32>
    %168 = vector.extract_strided_slice %7 {offsets = [7, 0, 0], sizes = [1, 8, 128], strides = [1, 1, 1]} : vector<8x8x128xf32> to vector<1x8x128xf32>
    %169 = vector.shape_cast %168 : vector<1x8x128xf32> to vector<8x128xf32>
    %cst_26 = arith.constant dense<0.000000e+00> : vector<8x128xf32>
    %170 = tpu.matmul %167, %8, %cst_26 {dimension_numbers = #tpu.dot_dimension_numbers<[1], [0], [0], [1], [0, 0, 1, 1], [], []>} : vector<8x32xf32>, vector<32x128xf32>, vector<8x128xf32> -> vector<8x128xf32>
    %171 = arith.addf %169, %170 : vector<8x128xf32>
    %172 = vector.extract_strided_slice %171 {offsets = [0, 0], sizes = [8, 96], strides = [1, 1]} : vector<8x128xf32> to vector<8x96xf32>
    %173 = arith.negf %172 : vector<8x96xf32>
    %174 = math.exp %173 : vector<8x96xf32>
    %cst_27 = arith.constant 1.000000e+00 : f32
    %175 = vector.broadcast %cst_27 : f32 to vector<8x96xf32>
    %176 = arith.addf %175, %174 : vector<8x96xf32>
    %177 = arith.divf %175, %176 : vector<8x96xf32>
    %178 = vector.extract_strided_slice %177 {offsets = [0, 0], sizes = [8, 32], strides = [1, 1]} : vector<8x96xf32> to vector<8x32xf32>
    %179 = vector.extract_strided_slice %177 {offsets = [0, 32], sizes = [8, 32], strides = [1, 1]} : vector<8x96xf32> to vector<8x32xf32>
    %180 = vector.extract_strided_slice %177 {offsets = [0, 64], sizes = [8, 32], strides = [1, 1]} : vector<8x96xf32> to vector<8x32xf32>
    %181 = vector.extract_strided_slice %171 {offsets = [0, 96], sizes = [8, 32], strides = [1, 1]} : vector<8x128xf32> to vector<8x32xf32>
    %182 = arith.mulf %11, %165 : vector<8x32xf32>
    %183 = arith.addf %181, %182 : vector<8x32xf32>
    %184 = math.tanh %183 : vector<8x32xf32>
    %185 = arith.mulf %178, %184 : vector<8x32xf32>
    %186 = arith.mulf %180, %165 : vector<8x32xf32>
    %187 = arith.addf %185, %186 : vector<8x32xf32>
    %188 = math.tanh %187 : vector<8x32xf32>
    %189 = arith.mulf %179, %188 : vector<8x32xf32>
    %190 = tpu.concatenate %187, %189 in 1 : vector<8x32xf32>, vector<8x32xf32> -> vector<8x64xf32>
    %c0_28 = arith.constant 0 : index
    %c0_29 = arith.constant 0 : index
    %191 = vector.load %arg6[%c0_28, %c0_29] : memref<8x64xf32, #tpu.memory_space<vmem>>, vector<8x64xf32>
    tpu.vector_store %arg6[%c0_28, %c0_29], %190 {strides = array<i32>} : memref<8x64xf32, #tpu.memory_space<vmem>>, vector<8x64xf32>,
    return
  }
  func.func @transform_0(%arg0: i32) -> (i32, i32, i32) {
    %c0_i32 = arith.constant 0 : i32
    %c0_i32_0 = arith.constant 0 : i32
    %c0_i32_1 = arith.constant 0 : i32
    return %c0_i32, %arg0, %c0_i32_0 : i32, i32, i32
  }
  func.func @transform_1(%arg0: i32) -> (i32, i32) {
    %c0_i32 = arith.constant 0 : i32
    %c0_i32_0 = arith.constant 0 : i32
    %c0_i32_1 = arith.constant 0 : i32
    return %c0_i32, %c0_i32_0 : i32, i32
  }
  func.func @transform_2(%arg0: i32) -> (i32, i32) {
    %c0_i32 = arith.constant 0 : i32
    %c0_i32_0 = arith.constant 0 : i32
    %c0_i32_1 = arith.constant 0 : i32
    return %c0_i32, %c0_i32_0 : i32, i32
  }
  func.func @transform_3(%arg0: i32) -> (i32, i32) {
    %c0_i32 = arith.constant 0 : i32
    %c0_i32_0 = arith.constant 0 : i32
    %c0_i32_1 = arith.constant 0 : i32
    return %c0_i32, %c0_i32_0 : i32, i32
  }
  func.func @transform_4(%arg0: i32) -> (i32, i32) {
    %c0_i32 = arith.constant 0 : i32
    %c0_i32_0 = arith.constant 0 : i32
    %c0_i32_1 = arith.constant 0 : i32
    return %c0_i32, %c0_i32_0 : i32, i32
  }
  func.func @transform_5(%arg0: i32) -> (i32, i32) {
    %c0_i32 = arith.constant 0 : i32
    %c0_i32_0 = arith.constant 0 : i32
    return %arg0, %c0_i32 : i32, i32
  }
}

</mosaic_0001>

<bundles_post_ra>
// kernel: tpu_custom_call.1
= control target key start
LH: loop header
LB: loop body
LE: loop exit
PB: predicated region body
PF: predicated region fallthrough
CT: control target
= control target key end

     0   :  { %10 = vsyncpa [#allocation3], 0  ;;  %s2405_s0 = inlined_call_operand.hbm [shape: f32[8,16,32], index: 0, kind: input, shape index: {}]   ;;  %s2406_s1 = inlined_call_operand.hbm [shape: f32[32,128], index: 1, kind: input, shape index: {}]   ;;  %s2407_s2 = inlined_call_operand.vmem [shape: f32[1,128], index: 2, kind: input, shape index: {}]   ;;  %s2408_s3 = inlined_call_operand.hbm [shape: f32[32,128], index: 3, kind: input, shape index: {}]   ;;  %s2409_s4 = inlined_call_operand.vmem [shape: f32[1,32], index: 4, kind: input, shape index: {}]   ;;  %s2410_s5 = inlined_call_operand.hbm [shape: f32[16,64], index: 5, kind: output, shape index: {}]  }
   0x1   :  { %12 = vsyncpa [#allocation3 + $0x1], 0 }
   0x2   :  { %13 = vsyncpa [#allocation6], 0 }
   0x3   :  { %14 = vsyncpa [#allocation4], 0 }
   0x4   :  { %16 = vsyncpa [#allocation4 + $0x1], 0  ;;  %s2009_s18 = smov 0   ;;  %s2011_s19 = smov 0  }
   0x5   :  { %s2013_s20 = smov 0   ;;  %s2015_s21 = smov 0  }
   0x6 LB: > { %s2030_s22 = sadd.s32 4294967295, %s1964_s21   ;;  %s1411_s23 = sadd.s32 4294967294, %s1964_s21   ;;  %s1964_s21 = sphi %s2015_s21, %s2438_s21   ;;  %s1960_s20 = sphi %s2013_s20, %s2437_s20   ;;  %s1956_s19 = sphi %s2011_s19, %s2436_s19   ;;  %s1952_s18 = sphi %s2009_s18, %s2435_s18  }
   0x7   : > { %s2034_s24 = sadd.s32 1, %s1964_s21   ;;  %s29_s25 = sadd.s32 1, %s1960_s20 }
   0x8   : > { %s26_s26 = ssub.s32 %s1964_s21, %s2034_s24  ;;  %p36_p0 = scmp.ne.s32.totalorder %s1960_s20, %s1956_s19 }
   0x9   : > { %p27_p1 = scmp.eq.s32.totalorder %s26_s26, 0  ;;  %p37_p2 = scmp.eq.s32.totalorder %s1964_s21, 0 }
   0xa   : > { %p42_p3 = scmp.ne.s32.totalorder %s1956_s19, %s1952_s18  ;;  %p2411_p4 = scmp.eq.s32.totalorder %s2030_s22, 0 }
   0xb   : > { %s2046_s27 = scalar_select %p27_p1, %s1960_s20, %s29_s25  }
   0xc   : > { %p2048_p5 = por %p37_p2, %p36_p0  ;;  %p2054_p6 = por %p2411_p4, %p42_p3 }
   0xd   : > { %p150_p7 = scmp.eq.s32.totalorder %s2030_s22, 1  ;;  %p156_p8 = scmp.eq.s32.totalorder %s1411_s23, 1 }
   0xe   : > { %s2417_s28 = scalar_select %p2048_p5, 1, 0 }
   0xf   : > { %s2418_s29 = scalar_select %p2054_p6, 1, 0 }
  0x10   : > { %p1412_p9 = scmp.ge.s32.totalorder %s1964_s21, 1  ;;  %p163_p10 = scmp.lt.s32.totalorder %s1964_s21, 3 }
  0x11   : > { %p2061_p11 = por %p150_p7, %p36_p0  ;;  %p2065_p12 = por %p156_p8, %p42_p3 }
  0x12   : > { %p2069_p13 = pnand %p1412_p9, %p163_p10  ;;  %s1966_s8 = smov [#allocation5]  }
  0x13   : > { %s2419_s30 = scalar_select %p2061_p11, 1, 0 }
  0x14   : > { %s2420_s6 = scalar_select %p2065_p12, 1, 0 }
  0x15   : > { %s2421_s7 = scalar_select %p2069_p13, 1, 0 }
  0x16   : > { %p1680_p1 = pneg %p2069_p13  ;;  %s175_s9 = sshll.u32 %s1966_s8, 4  ;;  %s176_s9 = int_to_ptr.vmem [resolvable:$true] %s175_s9 }
  0x17   : > { %s1967_s11 = smov [#allocation7]   ;;  %s1808_s15 = scalar_lea.hbm %s2406_s1, 512 }
  0x18   : > { %p2077_p2 = pnand %p1680_p1, %p2411_p4  ;;  %s191_s12 = sshll.u32 %s1967_s11, 4  ;;  %s192_s12 = int_to_ptr.vmem [resolvable:$true] %s191_s12 }
  0x19   : > { %p1809_p7 = scmp.ne.s32.totalorder %s2406_s1, %s1808_s15  ;;  %p1815_p1 = scmp.lt.u32.totalorder %s1808_s15, %s2406_s1 }
  0x1a   : > { %p1810_p8 = pneg %p2077_p2 }
  0x1c   : > { %p1811_p9 = pnand %p1810_p8, %p1809_p7 }
  0x1e   : > { %p1812_p10 = pneg %p1811_p9 }
  0x20   : > { %p1817_p0 = pnand %p1815_p1, %p1812_p10 }
  0x22   : > { %1820 = shalt.err (!%p1817_p0)
}
  0x23   : > { %s1821_s26 = scalar_lea.vmem %s176_s9, 512  ;;  %p1829_p11 = scmp.lt.s32.totalorder %s176_s9, %s176_s9 }
  0x24   : > { %p1822_p4 = scmp.ne.s32.totalorder %s176_s9, %s1821_s26  ;;  %p1830_p6 = scmp.lt.s32.totalorder %s1821_s26, %s1821_s26 }
  0x26   : > { %p1824_p3 = pnand %p1822_p4, %p1810_p8  ;;  %p1831_p13 = por %p1830_p6, %p1829_p11 }
  0x28   : > { %p1825_p12 = pneg %p1824_p3 }
  0x2a   : > { %p1832_p5 = pnand %p1831_p13, %p1825_p12 }
  0x2c   : > { %1835 = shalt.err (!%p1832_p5)
}
  0x2d   : > { %s2416_s8 = smov 128   ;;  %s1969_s11 = smov 8  }
  0x2e   : > { %1683 = dma.hbm_to_vmem [thread:$0]  (!%p2077_p2), %s2406_s1, 512, %s176_s9, [#allocation6], %s2416_s8, %s2416_s8, %s1969_s11  }
  0x2f   : > { %p2423_p4 = scmp.ne.s32.totalorder %s2417_s28, 0  ;;  %p2424_p0 = scmp.lt.s32.totalorder %s1964_s21, 2 }
  0x30   : > { %s1836_s23 = scalar_lea.hbm %s2408_s3, 512 }
  0x31   : > { %p2112_p3 = pnand %p2424_p0, %p2423_p4  ;;  %p1837_p5 = scmp.ne.s32.totalorder %s2408_s3, %s1836_s23 }
  0x32   : > { %p1843_p12 = scmp.lt.u32.totalorder %s1836_s23, %s2408_s3 }
  0x33   : > { %s2425_s15 = scalar_select %p2112_p3, 1, 0 }
  0x34   : > { %p1839_p6 = pnand %p1837_p5, %p1810_p8 }
  0x36   : > { %p1840_p11 = pneg %p1839_p6 }
  0x38   : > { %p1845_p13 = pnand %p1843_p12, %p1840_p11 }
  0x3a   : > { %1848 = shalt.err (!%p1845_p13)
}
  0x3b   : > { %s1849_s13 = scalar_lea.vmem %s192_s12, 512  ;;  %p1857_p1 = scmp.lt.s32.totalorder %s192_s12, %s192_s12 }
  0x3c   : > { %p1850_p7 = scmp.ne.s32.totalorder %s192_s12, %s1849_s13  ;;  %p1858_p4 = scmp.lt.s32.totalorder %s1849_s13, %s1849_s13 }
  0x3e   : > { %p1852_p9 = pnand %p1850_p7, %p1810_p8  ;;  %p1859_p0 = por %p1858_p4, %p1857_p1 }
  0x40   : > { %p1853_p10 = pneg %p1852_p9 }
  0x42   : > { %p1860_p3 = pnand %p1859_p0, %p1853_p10 }
  0x44   : > { %1863 = shalt.err (!%p1860_p3)
}
  0x45   : > { %1686 = dma.hbm_to_vmem [thread:$0]  (!%p2077_p2), %s2408_s3, 512, %s192_s12, [#allocation6], %s2416_s8, %s2416_s8, %s1969_s11  }
  0x46   : > { %s208_s17 = sand.u32 1, %s1960_s20   ;;  %s1417_s25 = sshll.u32 %s1964_s21, 7 }
  0x47   : > { %s1416_s23 = sshll.u32 %s208_s17, 6  ;;  %s2144_s28 = scalar_lea.hbm %s2405_s0, %s1417_s25 }
  0x48   : > { %s212_s10 = scalar_lea.vmem [#allocation2], %s1416_s23  ;;  %s2148_s14 = scalar_lea.sflag [#allocation3], %s208_s17 }
  0x49   : > { %s218_s13 = sshll.u32 %s212_s10, 4  ;;  %s1864_s16 = scalar_lea.hbm %s2144_s28, 1024  ;;  %s2146_s13 = int_to_ptr.vmem [resolvable:$true] %s218_s13 }
  0x4a   : > { %p1865_p2 = scmp.ne.s32.totalorder %s2144_s28, %s1864_s16  ;;  %p2426_p8 = scmp.ne.s32.totalorder %s2425_s15, 0 }
  0x4b   : > { %s1869_s26 = scalar_lea.hbm %s2405_s0, 2048  ;;  %p1870_p11 = scmp.lt.u32.totalorder %s2144_s28, %s2405_s0 }
  0x4c   : > { %p1866_p3 = pneg %p2426_p8  ;;  %p1871_p12 = scmp.lt.u32.totalorder %s1869_s26, %s1864_s16 }
  0x4d   : > { %p1873_p7 = scmp.lt.u32.totalorder %s1864_s16, %s2144_s28 }
  0x4e   : > { %p1867_p5 = pnand %p1866_p3, %p1865_p2  ;;  %p1872_p13 = por %p1871_p12, %p1870_p11 }
  0x50   : > { %p1868_p6 = pneg %p1867_p5  ;;  %p1874_p9 = por %p1873_p7, %p1872_p13 }
  0x52   : > { %p1875_p10 = pnand %p1874_p9, %p1868_p6 }
  0x54   : > { %1878 = shalt.err (!%p1875_p10)
}
  0x55   : > { %s1879_s17 = scalar_lea.vmem %s2146_s13, 1024  ;;  %s1970_s23 = smov [#allocation2]  }
  0x56   : > { %p1880_p1 = scmp.ne.s32.totalorder %s2146_s13, %s1879_s17  ;;  %s1884_s10 = sshll.u32 %s1970_s23, 4  ;;  %s1885_s10 = int_to_ptr.vmem [resolvable:$false] %s1884_s10 }
  0x57   : > { %s1886_s8 = scalar_lea.vmem %s1885_s10, 2048  ;;  %p1887_p2 = scmp.lt.s32.totalorder %s2146_s13, %s1885_s10 }
  0x58   : > { %p1882_p4 = pnand %p1880_p1, %p1866_p3  ;;  %p1888_p5 = scmp.lt.s32.totalorder %s1886_s8, %s1879_s17 }
  0x5a   : > { %p1883_p0 = pneg %p1882_p4  ;;  %p1889_p11 = por %p1888_p5, %p1887_p2 }
  0x5c   : > { %p1890_p12 = pnand %p1889_p11, %p1883_p0 }
  0x5e   : > { %1893 = shalt.err (!%p1890_p12)
}
  0x5f   : > { %s1971_s16 = smov 256   ;;  %s2427_s12 = smov 128  }
  0x60   : > { %1690 = dma.hbm_to_vmem [thread:$0]  (!%p2426_p8), %s2144_s28, 1024, %s2146_s13, %s2148_s14, %s1971_s16, %s2427_s12, %s1969_s11  }
  0x61   : > { %p2428_p3 = scmp.ne.s32.totalorder %s2421_s7, 0 }
  0x62   : > { %s2181_s25 = sand.u32 (!%p2428_p3), 1, %s1956_s19   ;;  %p2429_p6 = scmp.ne.s32.totalorder (!%p2428_p3), %s2418_s29, 0 }
  0x63   : > { %230 = sbr.rel (%p2428_p3) target bundleno = 4840 (0x12e8), region = 40  ;;  %s1419_s26 = sshll.u32 (!%p2428_p3), %s2181_s25, 6 }
  0x64   : > { %s233_s9 = scalar_lea.sflag (!%p2428_p3), [#allocation3], %s2181_s25  ;;  %s2185_s17 = scalar_lea.vmem (!%p2428_p3), [#allocation2], %s1419_s26 }
  0x6a   : > { %1939 = dma.done.wait (%p2429_p6), %s233_s9, 1024  }
  0x6b   : > { %1941 = vsyncadd (%p2429_p6), %s233_s9, 4294966272  ;;  %p2430_p8 = scmp.eq.s32.totalorder %s2030_s22, 0 }
  0x6d   : > { %1943 = dma.done.wait (%p2430_p8), [#allocation6], 1024   ;;  %p2431_p13 = pmov %p2430_p8 }
  0x6e   : > { %v1972_v0 = vmov 0.0|0.0   ;;  %vm1973_vm0 = vmmov 0   ;;  %v1974_v1 = vmov 0.0   ;;  %v279_v2 = vld [vmem:[#allocation5] sm:$0xff]  ;;  %v280_v3 = vld [vmem:[#allocation5 + $0x8] sm:$0xff]  ;;  %vm290_vm1 = vcmask 261120  }
  0x6f   : > { %1945 = vsyncadd (%p2431_p13), [#allocation6], 4294966272  ;;  %1620 = vmatprep.subr.bf16.mxu1 %v1972_v0  ;;  %1532 = vmatprep.mubr.msk.f32.mxu1 %vm1973_vm0, %v1974_v1  ;;  %v420_v4 = vld [vmem:[#allocation7] sm:$0xff]  ;;  %v1612_v5 = vpack.c.bf16 %v280_v3, %v279_v2  ;;  %v421_v6 = vld [vmem:[#allocation7 + $0x8] sm:$0xff]  ;;  %s1975_s11 = smov 96   ;;  %s1976_s13 = smov 32  }
  0x70   : > { %v281_v7 = vld [vmem:[#allocation5 + $0x10] sm:$0xff]  ;;  %v282_v8 = vld [vmem:[#allocation5 + $0x18] sm:$0xff]  ;;  %v2198_v9 = vpack.c.bf16 %v421_v6, %v420_v4  ;;  %v271_v11 = vld [vmem:[%s2185_s17] sm:$0xff]  ;;  %s1977_s14 = smov 64   ;;  %s1422_s23 = sshll.u32 %s2181_s25, 3  ;;  %vm1306_vm2 = vcmask 523264  }
  0x71   : > { %v1616_v10 = vpack.c.bf16 %v282_v8, %v281_v7  ;;  %v422_v12 = vld [vmem:[#allocation7 + $0x10] sm:$0xff]  ;;  %v423_v13 = vld [vmem:[#allocation7 + $0x18] sm:$0xff]  ;;  %1613 = vmatprep.subr.bf16.mxu0 %v1612_v5  ;;  %1512 = vmatprep.mubr.msk.f32.mxu0 %vm290_vm1, %v271_v11  ;;  %v2205_v14 = vld [vmem:[%s2409_s4] ss:$0 sm:$0xff]  ;;  %s1449_s10 = sshll.u32 %s2030_s22, 7  ;;  %s270_s8 = scalar_lea.vmem [#allocation8], %s1422_s23 }
  0x72   : > { %1615 = vmatpush3.bf16.msra.mxu0 %v1612_v5  ;;  %1622 = vmatpush3.bf16.msra.mxu1 %v2198_v9  ;;  %v2208_v15 = vpack.c.bf16 %v423_v13, %v422_v12  ;;  %v511_v16 = vmul.f32 0.0, %v2205_v14  ;;  %v272_v17 = vld [vmem:[%s2185_s17 + $0x8] sm:$0xff]  ;;  %v2232_v18 = vld [vmem:[%s2407_s2] ss:$0 sm:$0xff]  ;;  %v273_v59 = vld [vmem:[%s2185_s17 + $0x10] sm:$0xff]  ;;  %s1322_s16 = sshll.u32 %s270_s8, 4  ;;  %s2360_s9 = scalar_lea.hbm %s2410_s5, %s1449_s10  ;;  %s2362_s16 = int_to_ptr.vmem [resolvable:$true] %s1322_s16 }
  0x73   : > { %1617 = vmatprep.subr.bf16.mxu0 %v1616_v10  ;;  %1623 = vmatprep.subr.bf16.mxu1 %v1972_v0  ;;  %v274_v60 = vld [vmem:[%s2185_s17 + $0x18] sm:$0xff]  ;;  %v275_v61 = vld [vmem:[%s2185_s17 + $0x20] sm:$0xff]  ;;  %v276_v62 = vld [vmem:[%s2185_s17 + $0x28] sm:$0xff]  ;;  %s1894_s22 = scalar_lea.vmem %s2362_s16, 128  ;;  %p2432_p9 = scmp.ne.s32.totalorder %s2419_s30, 0 }
  0x74   : > { %513 = vrot.lane.b32.xlu0 %v511_v16, %s1975_s11  ;;  %v277_v63 = vld [vmem:[%s2185_s17 + $0x30] sm:$0xff]  ;;  %v278_v3 = vld [vmem:[%s2185_s17 + $0x38] sm:$0xff]  ;;  %s1309_s17 = scalar_lea.sflag [#allocation4], %s2181_s25  ;;  %p1895_p7 = scmp.ne.s32.totalorder %s2362_s16, %s1894_s22 }
  0x75   : > { %s1978_s29 = smov [#allocation8]  }
  0x76   : > { %1619 = vmatpush3.bf16.msra.mxu0 %v1616_v10  ;;  %1625 = vmatpush3.bf16.msra.mxu1 %v2208_v15  ;;  %p1896_p10 = pnand %p1895_p7, %p2432_p9  ;;  %s1898_s7 = sshll.u32 %s1978_s29, 4  ;;  %s1899_s7 = int_to_ptr.vmem [resolvable:$false] %s1898_s7 }
  0x77   : > { %1626 = vmatprep.subr.bf16.mxu1 %v1972_v0  ;;  %1632 = vmatprep.subr.bf16.mxu0 %v1972_v0  ;;  %p1901_p4 = scmp.lt.s32.totalorder %s2362_s16, %s1899_s7 }
  0x78   : > { %p1897_p1 = pneg %p1896_p10 }
  0x79   : > { %1513 = vmatmul.mubr.msk.f32.vlgmr.msra.gmra.mrb[0].mxu0 %vm290_vm1, %v272_v17  ;;  %1533 = vmatmul.mubr.f32.vlgmr.msra.gmra.mrb[0].mxu1 %v1974_v1 }
  0x7a   : > { %1628 = vmatpush3.bf16.msra.mxu1 %v2198_v9  ;;  %1543 = vmatprep.mubr.msk.f32.mxu1 %vm1973_vm0, %v1974_v1 }
  0x7b   : > { %1629 = vmatprep.subr.bf16.mxu1 %v1972_v0  ;;  %1634 = vmatpush3.bf16.msra.mxu0 %v2198_v9 }
  0x7c   : > { %1635 = vmatprep.subr.bf16.mxu0 %v1972_v0  ;;  %1515 = vmatprep.mubr.msk.f32.mxu0 %vm290_vm1, %v273_v59 }
  0x7d   : > { %1516 = vmatmul.mubr.msk.f32.gmra.mrb[2].mxu0 %vm290_vm1, %v274_v60 }
  0x7e   : > { %1631 = vmatpush3.bf16.msra.mxu1 %v2208_v15  ;;  %1518 = vmatprep.mubr.msk.f32.mxu0 %vm290_vm1, %v275_v61 }
  0x7f   : > { %1637 = vmatpush3.bf16.msra.mxu0 %v2208_v15  ;;  %1638 = vmatprep.subr.bf16.mxu1 %v1972_v0 }
  0x80   : > { %1644 = vmatprep.subr.bf16.mxu0 %v1972_v0 }
  0x81   : > { %1519 = vmatmul.mubr.msk.f32.gmra.mrb[4].mxu0 %vm290_vm1, %v276_v62 }
  0x82   : > { %1521 = vmatprep.mubr.msk.f32.mxu0 %vm290_vm1, %v277_v63 }
  0x85   : > { %1522 = vmatmul.mubr.msk.f32.gmra.mrb[6].mxu0 %vm290_vm1, %v278_v3 }
  0x86   : > { %1554 = vmatprep.mubr.msk.f32.mxu0 %vm1973_vm0, %v1974_v1 }
  0xe6   : > { %v514_v24 = vpop.permute.xlu0 %513 }
 0x14c   : > { %v1514_v19 = vpop.f32.mrb[0].mxu0  ;;  %v500_v20 = vpop.f32.mrb[0].mxu1 }
 0x14d   : > { %v381_v21 = vpop.f32.mrb[1].mxu0  ;;  %v1534_v22 = vpop.f32.mrb[1].mxu1  ;;  %v387_v42 = vadd.f32 %v1514_v19, %v2232_v18 }
 0x14e   : > { %v382_v23 = vadd.f32 %v2232_v18, %v381_v21 }
 0x150   : > { %v504_v25 = vadd.f32 %v500_v20, %v382_v23  ;;  %v1517_v7 = vpop.f32.mrb[2].mxu0 }
 0x151   : > { %v391_v8 = vpop.f32.mrb[3].mxu0 }
 0x152   : > { %v1433_v26 = vmul.f32 -1.442695, %v504_v25  ;;  %v516_v27 = vadd.f32 %v514_v24, %v504_v25  ;;  %v392_v17 = vadd.f32 %v2232_v18, %v391_v8 }
 0x154   : > { %1744 = vpow2.f32 %v1433_v26  ;;  %v2271_v10 = vpop.f32.mrb[4].mxu0 }
 0x155   : > { %1746 = vtanh.f32 %v516_v27  ;;  %v2273_v11 = vpop.f32.mrb[5].mxu0 }
 0x156   : > { %v402_v62 = vadd.f32 %v2232_v18, %v2273_v11 }
 0x158   : > { %v2275_v12 = vpop.f32.mrb[6].mxu0 }
 0x159   : > { %v2277_v13 = vpop.f32.mrb[7].mxu0 }
 0x15e   : > { %v1745_v28 = vpop.eup %1744 }
 0x15f   : > { %v1747_v29 = vpop.eup %1746  ;;  %v508_v30 = vadd.f32 1.0, %v1745_v28 }
 0x160   : > { %519 = vrot.lane.b32.xlu0 %v1747_v29, %s1976_s13 }
 0x161   : > { %1748 = vrcp.f32 %v508_v30 }
 0x16b   : > { %v1749_v31 = vpop.eup %1748 }
 0x16c   : > { %v523_v32 = vmul.f32 0.0, %v1749_v31 }
 0x16e   : > { %525 = vrot.lane.b32.xlu1 %v523_v32, %s1977_s14 }
 0x1d2   : > { %v520_v33 = vpop.permute.xlu0 %519 }
 0x1d3   : > { %v522_v34 = vmul.f32 %v1749_v31, %v520_v33 }
 0x1e0   : > { %v526_v35 = vpop.permute.xlu1 %525 }
 0x1e1   : > { %v528_v36 = vadd.f32 %v526_v35, %v522_v34 }
 0x1e3   : > { %1750 = vtanh.f32 %v528_v36  ;;  %v617_v38 = vmul.f32 %v2205_v14, %v528_v36 }
 0x1ed   : > { %v1751_v37 = vpop.eup %1750 }
 0x1ee   : > { %531 = vrot.lane.b32.xlu1 %v1751_v37, %s1976_s13 }
 0x1f2   : > { %619 = vrot.lane.b32.xlu1 %v617_v38, %s1975_s11 }
 0x260   : > { %v532_v39 = vpop.permute.xlu1 %531 }
 0x261   : > { %v534_v40 = vmul.f32 %v1749_v31, %v532_v39 }
 0x263   : > { %536 = vrot.lane.b32.xlu0 %v534_v40, %s1975_s11  ;;  %v397_v40 = vadd.f32 %v1517_v7, %v2232_v18 }
 0x264   : > { %v620_v46 = vpop.permute.xlu1 %619 }
 0x267   : > { %630 = vrot.lane.b32.xlu0 %v528_v36, %s1977_s14 }
 0x2d5   : > { %v537_v41 = vpop.permute.xlu0 %536 }
 0x2d6   : > { %1544 = vmatmul.mubr.msk.f32.vlgmr.msra.gmra.mrb[2].mxu1 %vm290_vm1, %v537_v41 }
 0x2d7   : > { %1640 = vmatpush3.bf16.msra.mxu1 %v2198_v9  ;;  %1565 = vmatprep.mubr.msk.f32.mxu1 %vm1973_vm0, %v1974_v1 }
 0x2d8   : > { %1641 = vmatprep.subr.bf16.mxu1 %v1972_v0 }
 0x2d9   : > { %v631_v53 = vpop.permute.xlu0 %630 }
 0x2db   : > { %1643 = vmatpush3.bf16.msra.mxu1 %v2208_v15 }
 0x2dc   : > { %1650 = vmatprep.subr.bf16.mxu1 %v1972_v0 }
 0x3a9   : > { %v606_v43 = vpop.f32.mrb[2].mxu1 }
 0x3aa   : > { %v610_v44 = vadd.f32 %v606_v43, %v387_v42  ;;  %v1545_v45 = vpop.f32.mrb[3].mxu1 }
 0x3ac   : > { %v1435_v47 = vmul.f32 -1.442695, %v610_v44  ;;  %v622_v48 = vadd.f32 %v620_v46, %v610_v44 }
 0x3ae   : > { %1752 = vpow2.f32 %v1435_v47 }
 0x3af   : > { %1754 = vtanh.f32 %v622_v48 }
 0x3b8   : > { %v1753_v49 = vpop.eup %1752 }
 0x3b9   : > { %v1755_v50 = vpop.eup %1754  ;;  %v614_v51 = vadd.f32 1.0, %v1753_v49 }
 0x3ba   : > { %625 = vrot.lane.b32.xlu1 %v1755_v50, %s1976_s13 }
 0x3bb   : > { %1756 = vrcp.f32 %v614_v51 }
 0x3c5   : > { %v1757_v52 = vpop.eup %1756 }
 0x3c6   : > { %v633_v54 = vmul.f32 %v1757_v52, %v631_v53 }
 0x3c8   : > { %635 = vrot.lane.b32.xlu0 %v633_v54, %s1977_s14 }
 0x42c   : > { %v626_v55 = vpop.permute.xlu1 %625 }
 0x42d   : > { %v628_v56 = vmul.f32 %v1757_v52, %v626_v55 }
 0x43a   : > { %v636_v57 = vpop.permute.xlu0 %635 }
 0x43b   : > { %v638_v58 = vadd.f32 %v636_v57, %v628_v56 }
 0x43d   : > { %1758 = vtanh.f32 %v638_v58  ;;  %v727_v4 = vmul.f32 %v2205_v14, %v638_v58 }
 0x447   : > { %v1759_v2 = vpop.eup %1758 }
 0x448   : > { %641 = vrot.lane.b32.xlu1 %v1759_v2, %s1976_s13 }
 0x44c   : > { %729 = vrot.lane.b32.xlu1 %v727_v4, %s1975_s11 }
 0x4ba   : > { %v642_v5 = vpop.permute.xlu1 %641 }
 0x4bb   : > { %v644_v6 = vmul.f32 %v1757_v52, %v642_v5 }
 0x4bd   : > { %646 = vrot.lane.b32.xlu0 %v644_v6, %s1975_s11 }
 0x4be   : > { %v730_v22 = vpop.permute.xlu1 %729 }
 0x4c1   : > { %740 = vrot.lane.b32.xlu0 %v638_v58, %s1977_s14 }
 0x52f   : > { %v647_v16 = vpop.permute.xlu0 %646 }
 0x530   : > { %1555 = vmatmul.mubr.msk.f32.vlgmr.msra.gmra.mrb[8].mxu0 %vm290_vm1, %v647_v16 }
 0x531   : > { %1646 = vmatpush3.bf16.msra.mxu0 %v2198_v9  ;;  %1576 = vmatprep.mubr.msk.f32.mxu0 %vm1973_vm0, %v1974_v1 }
 0x532   : > { %1647 = vmatprep.subr.bf16.mxu0 %v1972_v0 }
 0x533   : > { %v741_v29 = vpop.permute.xlu0 %740 }
 0x535   : > { %1649 = vmatpush3.bf16.msra.mxu0 %v2208_v15 }
 0x536   : > { %1656 = vmatprep.subr.bf16.mxu0 %v1972_v0 }
 0x603   : > { %v716_v19 = vpop.f32.mrb[8].mxu0 }
 0x604   : > { %v720_v20 = vadd.f32 %v716_v19, %v392_v17  ;;  %v1556_v21 = vpop.f32.mrb[9].mxu0 }
 0x606   : > { %v1437_v23 = vmul.f32 -1.442695, %v720_v20  ;;  %v732_v24 = vadd.f32 %v730_v22, %v720_v20 }
 0x608   : > { %1760 = vpow2.f32 %v1437_v23 }
 0x609   : > { %1762 = vtanh.f32 %v732_v24 }
 0x612   : > { %v1761_v25 = vpop.eup %1760 }
 0x613   : > { %v1763_v26 = vpop.eup %1762  ;;  %v724_v27 = vadd.f32 1.0, %v1761_v25 }
 0x614   : > { %735 = vrot.lane.b32.xlu1 %v1763_v26, %s1976_s13 }
 0x615   : > { %1764 = vrcp.f32 %v724_v27 }
 0x61f   : > { %v1765_v28 = vpop.eup %1764 }
 0x620   : > { %v743_v30 = vmul.f32 %v1765_v28, %v741_v29  ;;  %v407_v29 = vadd.f32 %v2271_v10, %v2232_v18 }
 0x622   : > { %745 = vrot.lane.b32.xlu0 %v743_v30, %s1977_s14 }
 0x686   : > { %v736_v31 = vpop.permute.xlu1 %735 }
 0x687   : > { %v738_v32 = vmul.f32 %v1765_v28, %v736_v31 }
 0x694   : > { %v746_v33 = vpop.permute.xlu0 %745 }
 0x695   : > { %v748_v34 = vadd.f32 %v746_v33, %v738_v32 }
 0x697   : > { %1766 = vtanh.f32 %v748_v34  ;;  %v837_v36 = vmul.f32 %v2205_v14, %v748_v34 }
 0x6a1   : > { %v1767_v35 = vpop.eup %1766 }
 0x6a2   : > { %751 = vrot.lane.b32.xlu1 %v1767_v35, %s1976_s13 }
 0x6a6   : > { %839 = vrot.lane.b32.xlu1 %v837_v36, %s1975_s11 }
 0x714   : > { %v752_v37 = vpop.permute.xlu1 %751 }
 0x715   : > { %v754_v38 = vmul.f32 %v1765_v28, %v752_v37 }
 0x717   : > { %756 = vrot.lane.b32.xlu0 %v754_v38, %s1975_s11 }
 0x718   : > { %v840_v44 = vpop.permute.xlu1 %839 }
 0x71b   : > { %850 = vrot.lane.b32.xlu0 %v748_v34, %s1977_s14 }
 0x789   : > { %v757_v39 = vpop.permute.xlu0 %756 }
 0x78a   : > { %1566 = vmatmul.mubr.msk.f32.vlgmr.msra.gmra.mrb[4].mxu1 %vm290_vm1, %v757_v39 }
 0x78b   : > { %1652 = vmatpush3.bf16.msra.mxu1 %v2198_v9  ;;  %1587 = vmatprep.mubr.msk.f32.mxu1 %vm1973_vm0, %v1974_v1 }
 0x78c   : > { %1653 = vmatprep.subr.bf16.mxu1 %v1972_v0 }
 0x78d   : > { %v851_v51 = vpop.permute.xlu0 %850 }
 0x78f   : > { %1655 = vmatpush3.bf16.msra.mxu1 %v2208_v15 }
 0x790   : > { %1662 = vmatprep.subr.bf16.mxu1 %v1972_v0 }
 0x85d   : > { %v826_v41 = vpop.f32.mrb[4].mxu1 }
 0x85e   : > { %v830_v42 = vadd.f32 %v826_v41, %v397_v40  ;;  %v1567_v43 = vpop.f32.mrb[5].mxu1 }
 0x860   : > { %v1439_v45 = vmul.f32 -1.442695, %v830_v42  ;;  %v842_v46 = vadd.f32 %v840_v44, %v830_v42 }
 0x862   : > { %1768 = vpow2.f32 %v1439_v45 }
 0x863   : > { %1770 = vtanh.f32 %v842_v46  ;;  %v412_v46 = vadd.f32 %v2232_v18, %v2277_v13 }
 0x86c   : > { %v1769_v47 = vpop.eup %1768 }
 0x86d   : > { %v1771_v48 = vpop.eup %1770  ;;  %v834_v49 = vadd.f32 1.0, %v1769_v47 }
 0x86e   : > { %845 = vrot.lane.b32.xlu1 %v1771_v48, %s1976_s13 }
 0x86f   : > { %1772 = vrcp.f32 %v834_v49 }
 0x879   : > { %v1773_v50 = vpop.eup %1772 }
 0x87a   : > { %v853_v52 = vmul.f32 %v1773_v50, %v851_v51 }
 0x87c   : > { %855 = vrot.lane.b32.xlu0 %v853_v52, %s1977_s14 }
 0x8e0   : > { %v846_v53 = vpop.permute.xlu1 %845 }
 0x8e1   : > { %v848_v54 = vmul.f32 %v1773_v50, %v846_v53 }
 0x8ee   : > { %v856_v55 = vpop.permute.xlu0 %855 }
 0x8ef   : > { %v858_v56 = vadd.f32 %v856_v55, %v848_v54 }
 0x8f1   : > { %1774 = vtanh.f32 %v858_v56  ;;  %v947_v58 = vmul.f32 %v2205_v14, %v858_v56 }
 0x8fb   : > { %v1775_v57 = vpop.eup %1774 }
 0x8fc   : > { %861 = vrot.lane.b32.xlu1 %v1775_v57, %s1976_s13 }
 0x900   : > { %949 = vrot.lane.b32.xlu1 %v947_v58, %s1975_s11 }
 0x96e   : > { %v862_v59 = vpop.permute.xlu1 %861 }
 0x96f   : > { %v864_v60 = vmul.f32 %v1773_v50, %v862_v59 }
 0x971   : > { %866 = vrot.lane.b32.xlu0 %v864_v60, %s1975_s11 }
 0x972   : > { %v950_v4 = vpop.permute.xlu1 %949 }
 0x975   : > { %960 = vrot.lane.b32.xlu0 %v858_v56, %s1977_s14 }
 0x9e3   : > { %v867_v61 = vpop.permute.xlu0 %866 }
 0x9e4   : > { %1577 = vmatmul.mubr.msk.f32.vlgmr.msra.gmra.mrb[10].mxu0 %vm290_vm1, %v867_v61 }
 0x9e5   : > { %1658 = vmatpush3.bf16.msra.mxu0 %v2198_v9  ;;  %1598 = vmatprep.mubr.msk.f32.mxu0 %vm1973_vm0, %v1974_v1 }
 0x9e6   : > { %1659 = vmatprep.subr.bf16.mxu0 %v1972_v0 }
 0x9e7   : > { %v961_v19 = vpop.permute.xlu0 %960 }
 0x9e9   : > { %1661 = vmatpush3.bf16.msra.mxu0 %v2208_v15 }
 0xab7   : > { %v936_v63 = vpop.f32.mrb[10].mxu0 }
 0xab8   : > { %v940_v2 = vadd.f32 %v936_v63, %v402_v62  ;;  %v1578_v3 = vpop.f32.mrb[11].mxu0 }
 0xaba   : > { %v1441_v5 = vmul.f32 -1.442695, %v940_v2  ;;  %v952_v6 = vadd.f32 %v950_v4, %v940_v2 }
 0xabc   : > { %1776 = vpow2.f32 %v1441_v5  ;;  %v417_v5 = vadd.f32 %v2275_v12, %v2232_v18 }
 0xabd   : > { %1778 = vtanh.f32 %v952_v6 }
 0xac6   : > { %v1777_v7 = vpop.eup %1776 }
 0xac7   : > { %v1779_v8 = vpop.eup %1778  ;;  %v944_v16 = vadd.f32 1.0, %v1777_v7 }
 0xac8   : > { %955 = vrot.lane.b32.xlu1 %v1779_v8, %s1976_s13 }
 0xac9   : > { %1780 = vrcp.f32 %v944_v16 }
 0xad3   : > { %v1781_v17 = vpop.eup %1780 }
 0xad4   : > { %v963_v20 = vmul.f32 %v1781_v17, %v961_v19 }
 0xad6   : > { %965 = vrot.lane.b32.xlu0 %v963_v20, %s1977_s14 }
 0xb3a   : > { %v956_v11 = vpop.permute.xlu1 %955 }
 0xb3b   : > { %v958_v21 = vmul.f32 %v1781_v17, %v956_v11 }
 0xb48   : > { %v966_v22 = vpop.permute.xlu0 %965 }
 0xb49   : > { %v968_v23 = vadd.f32 %v966_v22, %v958_v21 }
 0xb4b   : > { %1782 = vtanh.f32 %v968_v23  ;;  %v1057_v25 = vmul.f32 %v2205_v14, %v968_v23 }
 0xb55   : > { %v1783_v24 = vpop.eup %1782 }
 0xb56   : > { %971 = vrot.lane.b32.xlu1 %v1783_v24, %s1976_s13 }
 0xb5a   : > { %1059 = vrot.lane.b32.xlu1 %v1057_v25, %s1975_s11 }
 0xbc8   : > { %v972_v26 = vpop.permute.xlu1 %971 }
 0xbc9   : > { %v974_v27 = vmul.f32 %v1781_v17, %v972_v26 }
 0xbcb   : > { %976 = vrot.lane.b32.xlu0 %v974_v27, %s1975_s11 }
 0xbcc   : > { %v1060_v33 = vpop.permute.xlu1 %1059 }
 0xbcf   : > { %1070 = vrot.lane.b32.xlu0 %v968_v23, %s1977_s14 }
 0xc3d   : > { %v977_v28 = vpop.permute.xlu0 %976 }
 0xc3e   : > { %1588 = vmatmul.mubr.msk.f32.vlgmr.msra.gmra.mrb[6].mxu1 %vm290_vm1, %v977_v28 }
 0xc3f   : > { %1664 = vmatpush3.bf16.msra.mxu1 %v2198_v9  ;;  %1609 = vmatprep.mubr.msk.f32.mxu1 %vm1973_vm0, %v1974_v1 }
 0xc40   : > { %1665 = vmatprep.subr.bf16.mxu1 %v1972_v0 }
 0xc41   : > { %v1071_v1 = vpop.permute.xlu0 %1070 }
 0xc43   : > { %1667 = vmatpush3.bf16.msra.mxu1 %v2208_v15 }
 0xd11   : > { %v1046_v30 = vpop.f32.mrb[6].mxu1 }
 0xd12   : > { %v1050_v31 = vadd.f32 %v1046_v30, %v407_v29  ;;  %v1589_v32 = vpop.f32.mrb[7].mxu1 }
 0xd14   : > { %v1443_v34 = vmul.f32 -1.442695, %v1050_v31  ;;  %v1062_v35 = vadd.f32 %v1060_v33, %v1050_v31 }
 0xd16   : > { %1784 = vpow2.f32 %v1443_v34 }
 0xd17   : > { %1786 = vtanh.f32 %v1062_v35 }
 0xd20   : > { %v1785_v36 = vpop.eup %1784 }
 0xd21   : > { %v1787_v9 = vpop.eup %1786  ;;  %v1054_v37 = vadd.f32 1.0, %v1785_v36 }
 0xd22   : > { %1065 = vrot.lane.b32.xlu1 %v1787_v9, %s1976_s13 }
 0xd23   : > { %1788 = vrcp.f32 %v1054_v37 }
 0xd2d   : > { %v1789_v0 = vpop.eup %1788 }
 0xd2e   : > { %v1073_v15 = vmul.f32 %v1789_v0, %v1071_v1 }
 0xd30   : > { %1075 = vrot.lane.b32.xlu0 %v1073_v15, %s1977_s14 }
 0xd94   : > { %v1066_v10 = vpop.permute.xlu1 %1065 }
 0xd95   : > { %v1068_v38 = vmul.f32 %v1789_v0, %v1066_v10 }
 0xda2   : > { %v1076_v39 = vpop.permute.xlu0 %1075 }
 0xda3   : > { %v1078_v40 = vadd.f32 %v1076_v39, %v1068_v38 }
 0xda5   : > { %1790 = vtanh.f32 %v1078_v40  ;;  %v1167_v42 = vmul.f32 %v2205_v14, %v1078_v40 }
 0xdaf   : > { %v1791_v41 = vpop.eup %1790 }
 0xdb0   : > { %1081 = vrot.lane.b32.xlu1 %v1791_v41, %s1976_s13 }
 0xdb4   : > { %1169 = vrot.lane.b32.xlu1 %v1167_v42, %s1975_s11 }
 0xe22   : > { %v1082_v43 = vpop.permute.xlu1 %1081 }
 0xe23   : > { %v1084_v44 = vmul.f32 %v1789_v0, %v1082_v43 }
 0xe25   : > { %1086 = vrot.lane.b32.xlu0 %v1084_v44, %s1975_s11 }
 0xe26   : > { %v1170_v50 = vpop.permute.xlu1 %1169 }
 0xe29   : > { %1180 = vrot.lane.b32.xlu0 %v1078_v40, %s1977_s14 }
 0xe97   : > { %v1087_v45 = vpop.permute.xlu0 %1086 }
 0xe98   : > { %1599 = vmatmul.mubr.msk.f32.vlgmr.msra.gmra.mrb[12].mxu0 %vm290_vm1, %v1087_v45 }
 0xe9b   : > { %v1181_v57 = vpop.permute.xlu0 %1180 }
 0xf6b   : > { %v1156_v47 = vpop.f32.mrb[12].mxu0 }
 0xf6c   : > { %v1160_v48 = vadd.f32 %v1156_v47, %v412_v46  ;;  %v1600_v49 = vpop.f32.mrb[13].mxu0 }
 0xf6e   : > { %v1445_v51 = vmul.f32 -1.442695, %v1160_v48  ;;  %v1172_v52 = vadd.f32 %v1170_v50, %v1160_v48 }
 0xf70   : > { %1792 = vpow2.f32 %v1445_v51 }
 0xf71   : > { %1794 = vtanh.f32 %v1172_v52 }
 0xf7a   : > { %v1793_v53 = vpop.eup %1792 }
 0xf7b   : > { %v1795_v54 = vpop.eup %1794  ;;  %v1164_v55 = vadd.f32 1.0, %v1793_v53 }
 0xf7c   : > { %1175 = vrot.lane.b32.xlu1 %v1795_v54, %s1976_s13 }
 0xf7d   : > { %1796 = vrcp.f32 %v1164_v55 }
 0xf87   : > { %v1797_v56 = vpop.eup %1796 }
 0xf88   : > { %v1183_v58 = vmul.f32 %v1797_v56, %v1181_v57 }
 0xf8a   : > { %1185 = vrot.lane.b32.xlu0 %v1183_v58, %s1977_s14 }
 0xfee   : > { %v1176_v13 = vpop.permute.xlu1 %1175 }
 0xfef   : > { %v1178_v59 = vmul.f32 %v1797_v56, %v1176_v13 }
 0xffc   : > { %v1186_v60 = vpop.permute.xlu0 %1185 }
 0xffd   : > { %v1188_v61 = vadd.f32 %v1186_v60, %v1178_v59 }
 0xfff   : > { %1798 = vtanh.f32 %v1188_v61  ;;  %v1277_v63 = vmul.f32 %v2205_v14, %v1188_v61 }
0x1009   : > { %v1799_v62 = vpop.eup %1798 }
0x100a   : > { %1191 = vrot.lane.b32.xlu1 %v1799_v62, %s1976_s13 }
0x100e   : > { %1279 = vrot.lane.b32.xlu1 %v1277_v63, %s1975_s11 }
0x107c   : > { %v1192_v2 = vpop.permute.xlu1 %1191 }
0x107d   : > { %v1194_v3 = vmul.f32 %v1797_v56, %v1192_v2 }
0x107f   : > { %1196 = vrot.lane.b32.xlu0 %v1194_v3, %s1975_s11  ;;  %s1900_s11 = scalar_lea.vmem %s1899_s7, 256 }
0x1080   : > { %v1280_v16 = vpop.permute.xlu1 %1279  ;;  %p1902_p0 = scmp.lt.s32.totalorder %s1900_s11, %s1894_s22 }
0x1082   : > { %p1903_p2 = por %p1902_p0, %p1901_p4 }
0x1083   : > { %1290 = vrot.lane.b32.xlu0 %v1188_v61, %s1977_s14 }
0x1084   : > { %p1904_p5 = pnand %p1903_p2, %p1897_p1 }
0x10f1   : > { %v1197_v4 = vpop.permute.xlu0 %1196 }
0x10f2   : > { %1610 = vmatmul.mubr.msk.f32.vlgmr.msra.gmra.mrb[8].mxu1 %vm290_vm1, %v1197_v4 }
0x10f5   : > { %v1291_v22 = vpop.permute.xlu0 %1290 }
0x11c5   : > { %v1266_v6 = vpop.f32.mrb[8].mxu1 }
0x11c6   : > { %v1270_v7 = vadd.f32 %v1266_v6, %v417_v5  ;;  %v1611_v8 = vpop.f32.mrb[9].mxu1 }
0x11c8   : > { %v1447_v17 = vmul.f32 -1.442695, %v1270_v7  ;;  %v1282_v14 = vadd.f32 %v1280_v16, %v1270_v7 }
0x11ca   : > { %1800 = vpow2.f32 %v1447_v17 }
0x11cb   : > { %1802 = vtanh.f32 %v1282_v14 }
0x11d4   : > { %v1801_v19 = vpop.eup %1800 }
0x11d5   : > { %v1803_v20 = vpop.eup %1802  ;;  %v1274_v11 = vadd.f32 1.0, %v1801_v19 }
0x11d6   : > { %1285 = vrot.lane.b32.xlu1 %v1803_v20, %s1976_s13 }
0x11d7   : > { %1804 = vrcp.f32 %v1274_v11 }
0x11e1   : > { %v1805_v21 = vpop.eup %1804 }
0x11e2   : > { %v1293_v23 = vmul.f32 %v1805_v21, %v1291_v22 }
0x11e4   : > { %1295 = vrot.lane.b32.xlu0 %v1293_v23, %s1977_s14 }
0x1248   : > { %v1286_v18 = vpop.permute.xlu1 %1285 }
0x1249   : > { %v1288_v12 = vmul.f32 %v1805_v21, %v1286_v18 }
0x1256   : > { %v1296_v24 = vpop.permute.xlu0 %1295 }
0x1257   : > { %v1298_v25 = vadd.f32 %v1296_v24, %v1288_v12 }
0x1259   : > { %1806 = vtanh.f32 %v1298_v25 }
0x1263   : > { %v1807_v26 = vpop.eup %1806 }
0x1264   : > { %1301 = vrot.lane.b32.xlu1 %v1807_v26, %s1976_s13 }
0x12d6   : > { %v1302_v27 = vpop.permute.xlu1 %1301 }
0x12d7   : > { %v1304_v28 = vmul.f32 %v1805_v21, %v1302_v27 }
0x12d9   : > { %v1305_v29 = vsel %vm290_vm1, %v1298_v25, %v1304_v28 }
0x12da   : > { %1307 = vst.msk [vmem:[%s270_s8] sm:$0xff] %vm1306_vm2, %v1305_v29 }
0x12db   : > { %1907 = shalt.err (!%p1904_p5)
}
0x12dc   : > { %s1908_s25 = scalar_lea.hbm %s2360_s9, 128  ;;  %s1912_s13 = scalar_lea.hbm %s2410_s5, 256 }
0x12dd   : > { %p1909_p11 = scmp.ne.s32.totalorder %s2360_s9, %s1908_s25  ;;  %p1913_p6 = scmp.lt.u32.totalorder %s2360_s9, %s2410_s5 }
0x12de   : > { %p1914_p8 = scmp.lt.u32.totalorder %s1912_s13, %s1908_s25  ;;  %p1916_p7 = scmp.lt.u32.totalorder %s1908_s25, %s2360_s9 }
0x12df   : > { %p1910_p12 = pnand %p1909_p11, %p2432_p9 }
0x12e0   : > { %p1915_p13 = por %p1914_p8, %p1913_p6 }
0x12e1   : > { %p1911_p3 = pneg %p1910_p12 }
0x12e2   : > { %p1917_p10 = por %p1916_p7, %p1915_p13 }
0x12e4   : > { %p1918_p1 = pnand %p1917_p10, %p1911_p3 }
0x12e6   : > { %1921 = shalt.err (!%p1918_p1)
}
0x12e7   : > { %1678 = dma.vmem_to_hbm [thread:$0]  (%p2432_p9), %s2362_s16, 128, %s2360_s9, %s1309_s17  }
0x12e8 PF: > { %s1334_s10 = sand.u32 1, %s1952_s18   ;;  %p2433_p4 = scmp.ne.s32.totalorder %s2420_s6, 0 }
0x12e9   : > { %p2434_p0 = scmp.ge.s32.totalorder %s1964_s21, 2  ;;  %s1335_s8 = scalar_lea.sflag [#allocation4], %s1334_s10 }
0x12eb   : > { %p1692_p2 = pnand %p2434_p0, %p2433_p4 }
0x12ed   : > { %1947 = dma.done.wait (!%p1692_p2), %s1335_s8, 128  }
0x12ee   : > { %1949 = vsyncadd (!%p1692_p2), %s1335_s8, 4294967168  ;;  %p19_p5 = scmp.ge.s32.totalorder %s2034_s24, 4   ;;  %s2435_s18 = smov %s1956_s19 }
0x12ef   : > { %s2436_s19 = smov %s1960_s20  ;;  %s2437_s20 = smov %s2046_s27 }
0x12f0   : > { %s2438_s21 = smov %s2034_s24  ;;  %21 = sbr.rel (!%p19_p5) target bundleno = 6 (0x6), region = 93 }
0x12f7   :  { %1340 = vsyncpa [#allocation3], 1 }
0x12f8   :  { %1342 = vsyncpa [#allocation3 + $0x1], 1 }
0x12f9   :  { %1343 = vsyncpa [#allocation6], 1 }
0x12fa   :  { %1344 = vsyncpa [#allocation4], 1 }
0x12fb   :  { %1346 = vsyncpa [#allocation4 + $0x1], 1 }

</bundles_post_ra>
